<compile_context>
chip_gen: v7x
topology: tpu7x:2x2x1
jax: 0.10.0
libtpu: 0.0.40
codegen_flags: <defaults>
</compile_context>

<pallas_src>
import jax
import jax.numpy as jnp
from jax import lax
from jax.experimental import pallas as pl
from jax.experimental.pallas import tpu as pltpu


# ------------------------------ JAX wrapper --------------------------------- #

def _as_lane_rows(a):
    """Flatten to a (rows, 128) lane-dense f-dtype view.

    For contiguous floating inputs whose size is a multiple of 128 this is a
    pure reshape (no copy). Non-float masks (bool/int) are cast to f32 and the
    rare non-128-divisible size gets a <128-element zero pad.
    """
    flat = a.reshape(-1)
    if not jnp.issubdtype(flat.dtype, jnp.floating):
        flat = flat.astype(jnp.float32)
    rem = flat.shape[0] % 128
    if rem:
        # Rare fallback. x and y are padded identically with zeros, so the pad
        # contributes exactly 0 to both L1 terms regardless of the mask pad.
        flat = jnp.pad(flat, (0, 128 - rem))
    return flat.reshape(-1, 128)


def mask3_loss(x, y, mask, *, tile_rows=8192):
    """Pallas implementation of mask3.forward(x, y, mask) (torch L1Loss 'mean')."""
    n_elem = x.size                       # static Python int (true element count)

    x2d = _as_lane_rows(x)
    y2d = _as_lane_rows(y)
    m2d = _as_lane_rows(mask)
    rows = x2d.shape[0]                   # lane-dense row count (static)

    if rows <= tile_rows:
        tile_r = rows                     # single full-array block (no 8-div req.)
    else:
        tile_r = max(8, (tile_rows // 8) * 8)   # sublane-aligned row tile
    num_tiles = -(-rows // tile_r)        # cdiv
    has_ragged_tail = (rows % tile_r) != 0

    def kernel(x_ref, y_ref, m_ref, out_ref):
        xf = x_ref[...].astype(jnp.float32)
        yf = y_ref[...].astype(jnp.float32)
        mf = m_ref[...].astype(jnp.float32)
        # |x*m - y*m| + |x*(1-m) - y*(1-m)|  ==  |x - y| * (|m| + |1 - m|)
        prod = jnp.abs(xf - yf) * (jnp.abs(mf) + jnp.abs(1.0 - mf))
        if has_ragged_tail:
            # Partial last block: out-of-range rows hold stale VMEM -> mask them.
            row_idx = (pl.program_id(0) * tile_r
                       + lax.broadcasted_iota(jnp.int32, prod.shape, 0))
            prod = jnp.where(row_idx < rows, prod, 0.0)
        # Lane-dense per-tile partial: reduce rows only, keep the 128 lanes.
        out_ref[...] = jnp.sum(prod, axis=0, keepdims=True).reshape(1, 1, 128)

    bytes_accessed = (x2d.size * x2d.dtype.itemsize
                      + y2d.size * y2d.dtype.itemsize
                      + m2d.size * m2d.dtype.itemsize
                      + num_tiles * 128 * 4)

    partials = pl.pallas_call(
        kernel,
        grid=(num_tiles,),
        in_specs=[
            pl.BlockSpec((tile_r, 128), lambda i: (i, 0)),
            pl.BlockSpec((tile_r, 128), lambda i: (i, 0)),
            pl.BlockSpec((tile_r, 128), lambda i: (i, 0)),
        ],
        out_specs=pl.BlockSpec((1, 1, 128), lambda i: (i, 0, 0)),
        out_shape=jax.ShapeDtypeStruct((num_tiles, 1, 128), jnp.float32),
        compiler_params=pltpu.CompilerParams(
            dimension_semantics=("parallel",),
            vmem_limit_bytes=48 * 1024 * 1024,   # 24 MiB pipelined f32 + margin
        ),
        cost_estimate=pl.CostEstimate(
            flops=6 * n_elem, transcendentals=0, bytes_accessed=bytes_accessed),
    )(x2d, y2d, m2d)

    # Both L1Loss('mean') terms share the same denominator n_elem:
    #   mean(|x*m - y*m|) + mean(|x*(1-m) - y*(1-m)|) = total_sum / n_elem
    return jnp.sum(partials) / n_elem


# --------------------------------- main ------------------------------------- #

if __name__ == "__main__":
    key = jax.random.PRNGKey(0)
    kx, ky, km = jax.random.split(key, 3)

    B, C, H, W = 2, 4, 16, 16                        # NCHW
    x = jax.random.uniform(kx, (B, C, H, W), jnp.float32, minval=-1.0, maxval=1.0)
    y = jax.random.uniform(ky, (B, C, H, W), jnp.float32, minval=-1.0, maxval=1.0)
    mask = (jax.random.uniform(km, (B, C, H, W), jnp.float32) > 0.5).astype(jnp.float32)

    loss = jax.jit(mask3_loss)(x, y, mask)
    jax.block_until_ready(loss)

    # Reference check (pure JAX, mirrors torch.nn.L1Loss 'mean' semantics).
    ref = (jnp.mean(jnp.abs(x * mask - y * mask))
           + jnp.mean(jnp.abs(x * (1.0 - mask) - y * (1.0 - mask))))
    assert jnp.isfinite(loss)
    assert jnp.allclose(loss, ref, rtol=1e-4, atol=1e-5)
    print("KERNEL_OK")
</pallas_src>

<mosaic_0001>
module attributes {stable_mosaic.version = 11 : i64} {
  func.func @kernel(%arg0: i32, %arg1: memref<16x128xf32, #tpu.memory_space<vmem>>, %arg2: memref<16x128xf32, #tpu.memory_space<vmem>>, %arg3: memref<16x128xf32, #tpu.memory_space<vmem>>, %arg4: memref<1x1x128xf32, #tpu.memory_space<vmem>>) attributes {dimension_semantics = [#tpu.dimension_semantics<parallel>], iteration_bounds = array<i64: 1>, scalar_prefetch = 0 : i64, scratch_operands = 0 : i64, tpu.core_type = #tpu.core_type<tc>, window_params = [{transform_indices = @transform_0, window_bounds = array<i64: 16, 128>}, {transform_indices = @transform_1, window_bounds = array<i64: 16, 128>}, {transform_indices = @transform_2, window_bounds = array<i64: 16, 128>}, {transform_indices = @transform_3, window_bounds = array<i64: 1, 1, 128>}]} {
    %c0 = arith.constant 0 : index
    %c0_0 = arith.constant 0 : index
    %0 = vector.load %arg1[%c0, %c0_0] : memref<16x128xf32, #tpu.memory_space<vmem>>, vector<16x128xf32>
    %c0_1 = arith.constant 0 : index
    %c0_2 = arith.constant 0 : index
    %1 = vector.load %arg2[%c0_1, %c0_2] : memref<16x128xf32, #tpu.memory_space<vmem>>, vector<16x128xf32>
    %c0_3 = arith.constant 0 : index
    %c0_4 = arith.constant 0 : index
    %2 = vector.load %arg3[%c0_3, %c0_4] : memref<16x128xf32, #tpu.memory_space<vmem>>, vector<16x128xf32>
    %3 = arith.subf %0, %1 : vector<16x128xf32>
    %4 = math.absf %3 : vector<16x128xf32>
    %5 = math.absf %2 : vector<16x128xf32>
    %cst = arith.constant 1.000000e+00 : f32
    %6 = vector.broadcast %cst : f32 to vector<16x128xf32>
    %7 = arith.subf %6, %2 : vector<16x128xf32>
    %8 = math.absf %7 : vector<16x128xf32>
    %9 = arith.addf %5, %8 : vector<16x128xf32>
    %10 = arith.mulf %4, %9 : vector<16x128xf32>
    %cst_5 = arith.constant dense<0.000000e+00> : vector<128xf32>
    %11 = vector.multi_reduction <add>, %10, %cst_5 [0] : vector<16x128xf32> to vector<128xf32>
    %12 = vector.shape_cast %11 : vector<128xf32> to vector<1x128xf32>
    %13 = vector.shape_cast %12 : vector<1x128xf32> to vector<1x1x128xf32>
    %c0_6 = arith.constant 0 : index
    %c0_7 = arith.constant 0 : index
    %c0_8 = arith.constant 0 : index
    %14 = vector.load %arg4[%c0_6, %c0_7, %c0_8] : memref<1x1x128xf32, #tpu.memory_space<vmem>>, vector<1x1x128xf32>
    tpu.vector_store %arg4[%c0_6, %c0_7, %c0_8], %13 {strides = array<i32>} : memref<1x1x128xf32, #tpu.memory_space<vmem>>, vector<1x1x128xf32>,
    return
  }
  func.func @transform_0(%arg0: i32) -> (i32, i32) {
    %c0_i32 = arith.constant 0 : i32
    %c0_i32_0 = arith.constant 0 : i32
    return %arg0, %c0_i32 : i32, i32
  }
  func.func @transform_1(%arg0: i32) -> (i32, i32) {
    %c0_i32 = arith.constant 0 : i32
    %c0_i32_0 = arith.constant 0 : i32
    return %arg0, %c0_i32 : i32, i32
  }
  func.func @transform_2(%arg0: i32) -> (i32, i32) {
    %c0_i32 = arith.constant 0 : i32
    %c0_i32_0 = arith.constant 0 : i32
    return %arg0, %c0_i32 : i32, i32
  }
  func.func @transform_3(%arg0: i32) -> (i32, i32, i32) {
    %c0_i32 = arith.constant 0 : i32
    %c0_i32_0 = arith.constant 0 : i32
    %c0_i32_1 = arith.constant 0 : i32
    return %arg0, %c0_i32, %c0_i32_0 : i32, i32, i32
  }
}

</mosaic_0001>

<bundles_post_ra>
// kernel: mask3_loss.1
= control target key start
LH: loop header
LB: loop body
LE: loop exit
PB: predicated region body
PF: predicated region fallthrough
CT: control target
= control target key end

     0   :  { %s87_s0 = inlined_call_operand.vmem [shape: f32[16,128], index: 0, kind: input, shape index: {}]   ;;  %s88_s1 = inlined_call_operand.vmem [shape: f32[16,128], index: 1, kind: input, shape index: {}]   ;;  %s89_s2 = inlined_call_operand.vmem [shape: f32[16,128], index: 2, kind: input, shape index: {}]   ;;  %s90_s3 = inlined_call_operand.vmem [shape: f32[1,1,128], index: 3, kind: output, shape index: {}]  }
   0x1   :  { %v14_v0 = vld [vmem:[%s87_s0] sm:$0xff]  ;;  %v15_v1 = vld [vmem:[%s87_s0 + $0x8] sm:$0xff] }
   0x2   :  { %v16_v2 = vld [vmem:[%s88_s1] sm:$0xff]  ;;  %v17_v3 = vld [vmem:[%s88_s1 + $0x8] sm:$0xff] }
   0x3   :  { %v18_v4 = vld [vmem:[%s89_s2] sm:$0xff]  ;;  %v19_v5 = vld [vmem:[%s89_s2 + $0x8] sm:$0xff]  ;;  %v20_v6 = vsub.f32 %v14_v0, %v16_v2  ;;  %v21_v7 = vsub.f32 %v15_v1, %v17_v3 }
   0x4   :  { %v24_v8 = vand.u32 2147483647, %v18_v4  ;;  %v26_v9 = vsub.f32 1.0, %v18_v4  ;;  %v25_v10 = vand.u32 2147483647, %v19_v5  ;;  %v27_v11 = vsub.f32 1.0, %v19_v5 }
   0x5   :  { %v22_v12 = vand.u32 2147483647, %v20_v6  ;;  %v23_v14 = vand.u32 2147483647, %v21_v7 }
   0x6   :  { %v28_v13 = vand.u32 2147483647, %v26_v9  ;;  %v29_v15 = vand.u32 2147483647, %v27_v11 }
   0x8   :  { %v30_v16 = vadd.f32 %v28_v13, %v24_v8  ;;  %v31_v17 = vadd.f32 %v29_v15, %v25_v10 }
   0xa   :  { %v32_v18 = vmul.f32 %v30_v16, %v22_v12  ;;  %v33_v19 = vmul.f32 %v31_v17, %v23_v14 }
   0xc   :  { %v34_v20 = vadd.f32 %v33_v19, %v32_v18 }
   0xe   :  { %v35_v21 = vrot.slane %v34_v20, 4 }
  0x10   :  { %v36_v22 = vadd.f32 %v35_v21, %v34_v20 }
  0x12   :  { %v37_v23 = vrot.slane %v36_v22, 2 }
  0x14   :  { %v38_v24 = vadd.f32 %v37_v23, %v36_v22 }
  0x16   :  { %v39_v25 = vrot.slane %v38_v24, 1 }
  0x18   :  { %v40_v26 = vadd.f32 %v39_v25, %v38_v24 }
  0x1a   :  { %41 = vst [vmem:[%s90_s3] sm:$0x1] %v40_v26 }

</bundles_post_ra>
